<compile_context>
chip_gen: v7x
topology: tpu7x:2x2x1
jax: 0.10.0
libtpu: 0.0.40
codegen_flags: <defaults>
</compile_context>

<pallas_src>
import functools
import math

import jax
import jax.numpy as jnp
from jax.experimental import pallas as pl
from jax.experimental.pallas import tpu as pltpu


def _upsample_kernel(sel_ref, w_ref, x_ref, o_ref, *, C, W2):
    """One (batch, row-pair-block) grid step.

    sel_ref: (1, S)  int32  bit0 = output column parity j, bit1 = output row
             parity i, of each flat position inside its 2*W2-long row pair.
    w_ref:   (4C, C) f32    conv weight, rows grouped (i, j)-major, c-minor.
    x_ref:   (C, S)  f32    S = Hb input row-pairs, spatially flattened.
    o_ref:   (C, S)  f32    the same flat spatial range of the output.
    """
    x = x_ref[...]
    # Single fused conv matmul: all four (i, j) parity planes in one MXU call.
    r = jnp.dot(w_ref[...], x, preferred_element_type=jnp.float32)   # (4C, S)
    y00 = r[0 * C:1 * C, :]   # (i=0, j=0)
    y01 = r[1 * C:2 * C, :]   # (i=0, j=1)
    y10 = r[2 * C:3 * C, :]   # (i=1, j=0)
    y11 = r[3 * C:4 * C, :]   # (i=1, j=1)

    sel = sel_ref[...]                 # (1, S) int32, broadcast over channels
    is_odd = (sel & 1) == 1            # output column parity j
    is_up = sel >= 2                   # output row parity i

    # Output flat position p needs the conv value computed at input flat
    # position p - (i*W2 + j); a static lane rotation (XLU) moves it there.
    # (The rotated-in garbage at the wrap-around is never selected.)
    even_cols = jnp.where(is_up, pltpu.roll(y10, W2, axis=1), y00)
    odd_cols = jnp.where(is_up, pltpu.roll(y11, W2 + 1, axis=1),
                         pltpu.roll(y01, 1, axis=1))
    out = jnp.where(is_odd, odd_cols, even_cols)
    o_ref[...] = out.astype(o_ref.dtype)


def _plan_rows(C, Ho, period, n_batch, elem_cap=262144):
    """Pick Hb = decimated rows (row-pairs) per block and the padded row count.

    Constraints:
      * S = Hb * period must be a multiple of 128 (lane rule).
      * C * S <= elem_cap (soft VMEM budget: ~1 MiB per f32 buffer, so
        double-buffered in/out + the (4C, S) matmul result stay well inside
        the 48 MiB scoped-VMEM request on every generation incl. v7x).
      * If batch == 1, keep >= 2 grid steps so both v7x TensorCores get work.
    """
    m = 128 // math.gcd(period, 128)          # Hb granularity for the lane rule
    cap_rows = max(1, elem_cap // (C * period))
    hb = (cap_rows // m) * m
    if hb == 0:
        hb = m                                # bounded worst case: S <= 32 * period
    ho_ceil = m * math.ceil(Ho / m)
    hb = min(hb, ho_ceil)
    if n_batch * math.ceil(Ho / hb) < 2 and Ho > m:
        hb = m * math.ceil(Ho / (2 * m))      # split rows -> >= 2 grid steps
    ho_pad = hb * math.ceil(Ho / hb)
    return hb, ho_pad


def upsample_block_forward(x, weight):
    """x: (N, C, H, W) f32 NCHW; weight: (4C, C, 1, 1) f32 (no bias).
    Returns (N, C, 2*ceil(H/2), 2*ceil(W/2))."""
    N, C, H, W = x.shape
    assert weight.shape == (4 * C, C, 1, 1)
    Ho, Wo = (H + 1) // 2, (W + 1) // 2
    H2, W2 = 2 * Ho, 2 * Wo
    period = 2 * W2                            # flat length of one input row-pair

    hb, ho_pad = _plan_rows(C, Ho, period, N)
    S = hb * period
    H2p = 2 * ho_pad

    if (H2p, W2) != (H, W):
        # Odd spatial dims and/or row padding for lane-legal blocks.  Padded
        # rows/cols are never sampled into the real output region.
        x = jnp.pad(x, ((0, 0), (0, 0), (0, H2p - H), (0, W2 - W)))

    # Free reshape: flat spatial, so each block is a contiguous (C, S) slab.
    xf = x.reshape(N, C, H2p * W2)

    # Weight reorder (host side): rows grouped (i, j)-major, channel-minor, so
    # the kernel can slice the four parity planes out of one matmul result.
    #   wg[(2*i + j)*C + c, k] = weight[4*c + 2*i + j, k, 0, 0]
    w2 = weight[:, :, 0, 0]
    wg = w2.reshape(C, 2, 2, C).transpose(1, 2, 0, 3).reshape(4 * C, C)

    # Resident parity plane: bit0 = column parity, bit1 = "upper half of the
    # row pair" (i.e. odd output row).  Identical for every block.
    t = jnp.arange(S, dtype=jnp.int32) % period
    sel = ((t & 1) + 2 * (t >= W2).astype(jnp.int32)).reshape(1, S)

    grid = (N, ho_pad // hb)
    kernel = functools.partial(_upsample_kernel, C=C, W2=W2)
    out_flat = pl.pallas_call(
        kernel,
        out_shape=jax.ShapeDtypeStruct((N, C, H2p * W2), x.dtype),
        grid_spec=pltpu.PrefetchScalarGridSpec(
            num_scalar_prefetch=0,
            grid=grid,
            in_specs=[
                pl.BlockSpec((1, S), lambda n, b: (0, 0)),        # parity plane
                pl.BlockSpec((4 * C, C), lambda n, b: (0, 0)),    # weights
                pl.BlockSpec((None, C, S), lambda n, b: (n, 0, b)),
            ],
            out_specs=pl.BlockSpec((None, C, S), lambda n, b: (n, 0, b)),
        ),
        compiler_params=pltpu.CompilerParams(
            dimension_semantics=("parallel", "parallel"),
            vmem_limit_bytes=48 * 1024 * 1024,   # safe on v5e/v6e (128 MiB) and v7x (64 MiB)
        ),
    )(sel, wg, xf)

    out = out_flat.reshape(N, C, H2p, W2)
    if H2p != H2:
        out = out[:, :, :H2, :]
    return out


def _reference_forward(x, weight):
    """Pure-JAX reference (same math as the PyTorch module)."""
    xs = x[:, :, ::2, ::2]
    N, C, Ho, Wo = xs.shape
    w2d = weight[:, :, 0, 0]                        # (4C, C)
    conv = jnp.einsum("nchw,oc->nohw", xs, w2d)     # (N, 4C, Ho, Wo)
    y = conv.reshape(N, C, 2, 2, Ho, Wo)
    y = jnp.transpose(y, (0, 1, 4, 2, 5, 3))
    return y.reshape(N, C, 2 * Ho, 2 * Wo)


if __name__ == "__main__":
    key = jax.random.PRNGKey(0)
    kx, kw = jax.random.split(key)

    Nb, C, H, W = 2, 4, 16, 16
    x = jax.random.normal(kx, (Nb, C, H, W), dtype=jnp.float32)
    # Deterministic synthetic Conv2d weight: (out=4C, in=C, 1, 1), no bias.
    weight = (jax.random.normal(kw, (4 * C, C, 1, 1), dtype=jnp.float32)
              * (1.0 / jnp.sqrt(C)))

    fwd = jax.jit(upsample_block_forward)
    out = jax.block_until_ready(fwd(x, weight))

    ref = _reference_forward(x, weight)
    assert out.shape == (Nb, C, H, W), out.shape
    assert jnp.allclose(out, ref, atol=1e-4, rtol=1e-4), float(
        jnp.max(jnp.abs(out - ref)))

    print("KERNEL_OK")
</pallas_src>

<mosaic_0001>
module attributes {stable_mosaic.version = 11 : i64} {
  func.func @_upsample_kernel(%arg0: i32, %arg1: i32, %arg2: memref<1x256xi32, #tpu.memory_space<vmem>>, %arg3: memref<16x4xf32, #tpu.memory_space<vmem>>, %arg4: memref<1x4x256xf32, #tpu.memory_space<vmem>>, %arg5: memref<1x4x256xf32, #tpu.memory_space<vmem>>) attributes {dimension_semantics = [#tpu.dimension_semantics<parallel>, #tpu.dimension_semantics<parallel>], iteration_bounds = array<i64: 2, 1>, scalar_prefetch = 0 : i64, scratch_operands = 0 : i64, tpu.core_type = #tpu.core_type<tc>, window_params = [{pipeline_mode = #tpu.pipeline_mode<synchronous>, transform_indices = @transform_0, window_bounds = array<i64: 1, 256>}, {pipeline_mode = #tpu.pipeline_mode<synchronous>, transform_indices = @transform_1, window_bounds = array<i64: 16, 4>}, {transform_indices = @transform_2, window_bounds = array<i64: 1, 4, 256>}, {transform_indices = @transform_3, window_bounds = array<i64: 1, 4, 256>}]} {
    %c0 = arith.constant 0 : index
    %c0_0 = arith.constant 0 : index
    %c0_1 = arith.constant 0 : index
    %0 = vector.load %arg4[%c0, %c0_0, %c0_1] : memref<1x4x256xf32, #tpu.memory_space<vmem>>, vector<1x4x256xf32>
    %1 = vector.shape_cast %0 : vector<1x4x256xf32> to vector<4x256xf32>
    %c0_2 = arith.constant 0 : index
    %c0_3 = arith.constant 0 : index
    %2 = vector.load %arg3[%c0_2, %c0_3] : memref<16x4xf32, #tpu.memory_space<vmem>>, vector<16x4xf32>
    %cst = arith.constant dense<0.000000e+00> : vector<16x256xf32>
    %3 = tpu.matmul %2, %1, %cst {dimension_numbers = #tpu.dot_dimension_numbers<[1], [0], [0], [1], [0, 0, 1, 1], [], []>} : vector<16x4xf32>, vector<4x256xf32>, vector<16x256xf32> -> vector<16x256xf32>
    %4 = vector.extract_strided_slice %3 {offsets = [0, 0], sizes = [4, 256], strides = [1, 1]} : vector<16x256xf32> to vector<4x256xf32>
    %5 = vector.extract_strided_slice %3 {offsets = [4, 0], sizes = [4, 256], strides = [1, 1]} : vector<16x256xf32> to vector<4x256xf32>
    %6 = vector.extract_strided_slice %3 {offsets = [8, 0], sizes = [4, 256], strides = [1, 1]} : vector<16x256xf32> to vector<4x256xf32>
    %7 = vector.extract_strided_slice %3 {offsets = [12, 0], sizes = [4, 256], strides = [1, 1]} : vector<16x256xf32> to vector<4x256xf32>
    %c0_4 = arith.constant 0 : index
    %c0_5 = arith.constant 0 : index
    %8 = vector.load %arg2[%c0_4, %c0_5] : memref<1x256xi32, #tpu.memory_space<vmem>>, vector<1x256xi32>
    %c1_i32 = arith.constant 1 : i32
    %9 = vector.broadcast %c1_i32 : i32 to vector<1x256xi32>
    %10 = arith.andi %8, %9 : vector<1x256xi32>
    %c1_i32_6 = arith.constant 1 : i32
    %11 = vector.broadcast %c1_i32_6 : i32 to vector<1x256xi32>
    %12 = arith.cmpi eq, %10, %11 : vector<1x256xi32>
    %c2_i32 = arith.constant 2 : i32
    %13 = vector.broadcast %c2_i32 : i32 to vector<1x256xi32>
    %14 = arith.cmpi sge, %8, %13 : vector<1x256xi32>
    %c16_i32 = arith.constant 16 : i32
    %15 = tpu.dynamic_rotate %6 by %c16_i32 dim 1 : vector<4x256xf32>, i32 -> vector<4x256xf32>
    %16 = vector.shape_cast %14 : vector<1x256xi1> to vector<1x256xi1>
    %17 = vector.broadcast %16 : vector<1x256xi1> to vector<4x256xi1>
    %18 = arith.select %17, %15, %4 : vector<4x256xi1>, vector<4x256xf32>
    %c17_i32 = arith.constant 17 : i32
    %19 = tpu.dynamic_rotate %7 by %c17_i32 dim 1 : vector<4x256xf32>, i32 -> vector<4x256xf32>
    %c1_i32_7 = arith.constant 1 : i32
    %20 = tpu.dynamic_rotate %5 by %c1_i32_7 dim 1 : vector<4x256xf32>, i32 -> vector<4x256xf32>
    %21 = vector.shape_cast %14 : vector<1x256xi1> to vector<1x256xi1>
    %22 = vector.broadcast %21 : vector<1x256xi1> to vector<4x256xi1>
    %23 = arith.select %22, %19, %20 : vector<4x256xi1>, vector<4x256xf32>
    %24 = vector.shape_cast %12 : vector<1x256xi1> to vector<1x256xi1>
    %25 = vector.broadcast %24 : vector<1x256xi1> to vector<4x256xi1>
    %26 = arith.select %25, %23, %18 : vector<4x256xi1>, vector<4x256xf32>
    %c0_8 = arith.constant 0 : index
    %c0_9 = arith.constant 0 : index
    %c0_10 = arith.constant 0 : index
    %27 = vector.load %arg5[%c0_8, %c0_9, %c0_10] : memref<1x4x256xf32, #tpu.memory_space<vmem>>, vector<1x4x256xf32>
    %28 = vector.shape_cast %27 : vector<1x4x256xf32> to vector<4x256xf32>
    %29 = vector.shape_cast %26 : vector<4x256xf32> to vector<1x4x256xf32>
    tpu.vector_store %arg5[%c0_8, %c0_9, %c0_10], %29 {strides = array<i32>} : memref<1x4x256xf32, #tpu.memory_space<vmem>>, vector<1x4x256xf32>,
    return
  }
  func.func @transform_0(%arg0: i32, %arg1: i32) -> (i32, i32) {
    %c0_i32 = arith.constant 0 : i32
    %c0_i32_0 = arith.constant 0 : i32
    %c0_i32_1 = arith.constant 0 : i32
    return %c0_i32, %c0_i32_0 : i32, i32
  }
  func.func @transform_1(%arg0: i32, %arg1: i32) -> (i32, i32) {
    %c0_i32 = arith.constant 0 : i32
    %c0_i32_0 = arith.constant 0 : i32
    %c0_i32_1 = arith.constant 0 : i32
    return %c0_i32, %c0_i32_0 : i32, i32
  }
  func.func @transform_2(%arg0: i32, %arg1: i32) -> (i32, i32, i32) {
    %c0_i32 = arith.constant 0 : i32
    %c0_i32_0 = arith.constant 0 : i32
    return %arg0, %c0_i32, %arg1 : i32, i32, i32
  }
  func.func @transform_3(%arg0: i32, %arg1: i32) -> (i32, i32, i32) {
    %c0_i32 = arith.constant 0 : i32
    %c0_i32_0 = arith.constant 0 : i32
    return %arg0, %c0_i32, %arg1 : i32, i32, i32
  }
}

</mosaic_0001>

<bundles_post_ra>
// kernel: upsample_block_forward.1
= control target key start
LH: loop header
LB: loop body
LE: loop exit
PB: predicated region body
PF: predicated region fallthrough
CT: control target
= control target key end

     0   :  { %s561_s12 = smov 0   ;;  %s563_s13 = smov 0   ;;  %s610_s0 = inlined_call_operand.vmem [shape: s32[1,256], index: 0, kind: input, shape index: {}]   ;;  %s611_s1 = inlined_call_operand.vmem [shape: f32[16,4], index: 1, kind: input, shape index: {}]   ;;  %s612_s2 = inlined_call_operand.vmem [shape: f32[2,4,256], index: 2, kind: input, shape index: {}]   ;;  %s613_s3 = inlined_call_operand.vmem [shape: f32[2,4,256], index: 3, kind: output, shape index: {}]  }
   0x1   :  { %s565_s14 = smov 0  }
   0x2 LB: > { %s25_s15 = sadd.s32 1, %s530_s13  ;;  %p467_p0 = scmp.ge.s32.totalorder %s534_s14, 1  ;;  %s534_s14 = sphi %s565_s14, %s13_s14   ;;  %s530_s13 = sphi %s563_s13, %s615_s13   ;;  %s526_s12 = sphi %s561_s12, %s614_s12  }
   0x3   : > { %p27_p1 = scmp.ge.s32.totalorder %s25_s15, 2  ;;  %p158_p2 = scmp.lt.s32.totalorder %s534_s14, 3 }
   0x5   : > { %s617_s15 = smov (%p27_p1, %s25_s15), 0  ;;  %p159_p3 = pnand %p467_p0, %p158_p2 }
   0x6   : > { %p191_p4 = scmp.lt.s32.totalorder (!%p159_p3), %s526_s12, 1  ;;  %v536_v0 = vmov (!%p159_p3), 0.0   ;;  %vm222_vm0 = vcmask (!%p159_p3), 1043456   ;;  %v212_v3 = vld [vmem:[%s611_s1 + $0x8] sm:$0xff] (!%p159_p3)  ;;  %vm215_vm1 = vcmask (!%p159_p3), 31744   ;;  %v211_v4 = vld [vmem:[%s611_s1] sm:$0xff] (!%p159_p3)  ;;  %v312_v13 = vlaneseq (!%p159_p3) }
   0x7   : > { %162 = sbr.rel (%p159_p3) target bundleno = 365 (0x16d), region = 32  ;;  %297 = vmatprep.mubr.f32.mxu1 (!%p159_p3), %v536_v0  ;;  %291 = vmatprep.mubr.f32.mxu0 (!%p159_p3), %v536_v0  ;;  %s537_s24 = smov (!%p159_p3), 16   ;;  %v304_v14 = vld [vmem:[%s610_s0] sm:$0x3] (!%p159_p3)  ;;  %v540_v22 = vmov (!%p159_p3), 0  }
   0x8   : > { %s538_s25 = smov (!%p159_p3), 17   ;;  %s539_s26 = smov (!%p159_p3), 1   ;;  %v305_v15 = vand.u32 (!%p159_p3), 1, %v304_v14  ;;  %v319_v16 = vshrl.u32 (!%p159_p3), %v312_v13, 7  ;;  %vm307_vm2 = vcmp.ge.s32.totalorder (!%p159_p3), %v304_v14, 2  ;;  %v313_v21 = vand.u32 (!%p159_p3), 127, %v312_v13 }
   0x9   : > { %v317_v23 = vsel (!%p159_p3), %vm307_vm2, 1, %v540_v22 }
   0xa   : > { %vm306_vm3 = vcmp.eq.s32.totalorder (!%p159_p3), %v305_v15, 1  ;;  %v320_v18 = vsub.s32 (!%p159_p3), 0, %v319_v16  ;;  %v324_v19 = vsub.s32 (!%p159_p3), 1, %v319_v16  ;;  %vm314_vm4 = vcmp.lt.s32.totalorder (!%p159_p3), %v313_v21, 16 }
   0xb   : > { %v358_v24 = vsel (!%p159_p3), %vm306_vm3, 1, %v540_v22  ;;  %vm340_vm5 = vcmp.lt.s32.totalorder (!%p159_p3), %v313_v21, 17  ;;  %vm353_vm6 = vcmp.lt.s32.totalorder (!%p159_p3), %v313_v21, 1 }
   0xc   : > { %v321_v26 = vrot.slane (!%p159_p3), %v317_v23, %v320_v18  ;;  %v325_v27 = vrot.slane (!%p159_p3), %v317_v23, %v324_v19  ;;  %v362_v29 = vrot.slane (!%p159_p3), %v358_v24, %v320_v18  ;;  %v366_v30 = vrot.slane (!%p159_p3), %v358_v24, %v324_v19 }
   0xe   : > { %s619_s12 = smov (!%p191_p4, %s526_s12), 1  ;;  %vm326_vm7 = vcmp.eq.s32.totalorder %v321_v26, 1  ;;  %vm327_vm8 = vcmp.eq.s32.totalorder %v325_v27, 1  ;;  %vm367_vm9 = vcmp.eq.s32.totalorder %v362_v29, 1  ;;  %vm368_vm10 = vcmp.eq.s32.totalorder %v366_v30, 1 }
   0xf   : > { %s478_s16 = sshll.u32 %s619_s12, 3 }
  0x10   : > { %s198_s19 = scalar_lea.vmem %s612_s2, %s478_s16  ;;  %s208_s4 = scalar_lea.vmem %s613_s3, %s478_s16 }
  0x11   : > { %v210_v1 = vld [vmem:[%s198_s19] sm:$0xff] }
  0x12   : > { %v214_v2 = vcombine.high %v210_v1, %v210_v1 }
  0x14   : > { %480 = vmatprep.subr.msk.mxu1 %vm222_vm0, %v214_v2  ;;  %472 = vmatprep.subr.msk.mxu0 %vm222_vm0, %v214_v2 }
  0x15   : > { %481 = vmatpush1.msk.msra.mxu1 %vm222_vm0, %v210_v1  ;;  %473 = vmatpush1.msk.msra.mxu0 %vm222_vm0, %v210_v1 }
  0x16   : > { %475 = vmatmul.mubr.msk.f32.vlgmr.msra.gmra.mrb[0].mxu1 %vm215_vm1, %v212_v3  ;;  %474 = vmatmul.mubr.msk.f32.vlgmr.msra.gmra.mrb[0].mxu0 %vm215_vm1, %v211_v4 }
  0xe9   : > { %v299_v5 = vpop.f32.mrb[0].mxu1  ;;  %v293_v6 = vpop.f32.mrb[0].mxu0 }
  0xea   : > { %308 = vrot.lane.b32.xlu0 %v299_v5, %s537_s24  ;;  %v301_v7 = vpop.f32.mrb[1].mxu1  ;;  %v332_v8 = vrot.slane %v299_v5, 4  ;;  %v295_v9 = vpop.f32.mrb[1].mxu0  ;;  %v345_v11 = vrot.slane %v293_v6, 4 }
  0xeb   : > { %v333_v10 = vrot.slane %v301_v7, 4  ;;  %v346_v12 = vrot.slane %v295_v9, 4 }
  0xec   : > { %336 = vrot.lane.b32.xlu1 %v332_v8, %s538_s25 }
  0xee   : > { %310 = vrot.lane.b32.xlu0 %v301_v7, %s537_s24 }
  0xf0   : > { %338 = vrot.lane.b32.xlu1 %v333_v10, %s538_s25 }
  0xf2   : > { %349 = vrot.lane.b32.xlu0 %v345_v11, %s539_s26 }
  0xf4   : > { %351 = vrot.lane.b32.xlu1 %v346_v12, %s539_s26 }
 0x15c   : > { %v309_v17 = vpop.permute.xlu0 %308 }
 0x15e   : > { %v337_v20 = vpop.permute.xlu1 %336 }
 0x160   : > { %v311_v25 = vpop.permute.xlu0 %310 }
 0x161   : > { %v315_v32 = vsel %vm314_vm4, %v309_v17, %v311_v25  ;;  %v316_v33 = vsel %vm314_vm4, %v311_v25, %v309_v17 }
 0x162   : > { %v339_v28 = vpop.permute.xlu1 %338  ;;  %v328_v39 = vsel %vm326_vm7, %v316_v33, %v293_v6  ;;  %v329_v40 = vsel %vm327_vm8, %v315_v32, %v295_v9 }
 0x163   : > { %v341_v35 = vsel %vm340_vm5, %v337_v20, %v339_v28  ;;  %v342_v36 = vsel %vm340_vm5, %v339_v28, %v337_v20 }
 0x164   : > { %v350_v31 = vpop.permute.xlu0 %349 }
 0x166   : > { %v352_v34 = vpop.permute.xlu1 %351 }
 0x167   : > { %v354_v37 = vsel %vm353_vm6, %v350_v31, %v352_v34  ;;  %v355_v38 = vsel %vm353_vm6, %v352_v34, %v350_v31 }
 0x168   : > { %v356_v41 = vsel %vm326_vm7, %v342_v36, %v355_v38  ;;  %v357_v42 = vsel %vm327_vm8, %v341_v35, %v354_v37 }
 0x169   : > { %v369_v43 = vsel %vm367_vm9, %v356_v41, %v328_v39  ;;  %v370_v44 = vsel %vm368_vm10, %v357_v42, %v329_v40 }
 0x16a   : > { %v373_v45 = vcombine.low %v369_v43, %v370_v44 }
 0x16c   : > { %375 = vst [vmem:[%s208_s4] sm:$0xff] %v373_v45 }
 0x16d PF: > { %s13_s14 = sadd.s32 1, %s534_s14   ;;  %s614_s12 = smov %s530_s13 }
 0x16e   : > { %p10_p5 = scmp.ge.s32.totalorder %s13_s14, 4   ;;  %s615_s13 = smov %s617_s15 }
 0x170   :  { %12 = sbr.rel (!%p10_p5) target bundleno = 2 (0x2), region = 62 }

</bundles_post_ra>
